<compile_context>
chip_gen: v7x
topology: tpu7x:2x2x1
jax: 0.10.0
libtpu: 0.0.40
codegen_flags: <defaults>
</compile_context>

<pallas_src>
import jax
import jax.numpy as jnp
from jax.experimental import pallas as pl
from jax.experimental.pallas import tpu as pltpu

HIDDEN1 = 256
HIDDEN2 = 128


def _round_up(n, m):
    return ((n + m - 1) // m) * m


def _choose_tile(B, tm):
    """Batch tile: big (amortize ~0.35 us/step), multiple of 8 sublanes,
    but small enough to keep >=4 grid steps for moderate B so v7x's two
    TensorCores share the batch grid; no-op consideration on v5e/v6e."""
    per_step_for_4 = _round_up(pl.cdiv(B, 4), 128)   # aim for >= 4 steps
    tm_eff = min(tm, max(per_step_for_4, 128))
    tm_eff = min(tm_eff, _round_up(B, 8))            # never exceed (padded) batch
    return max(8, _round_up(tm_eff, 8))


def _local_logistic_kernel(x_ref, w1_ref, b1_ref, w2_ref, b2_ref, o_ref):
    # fc1 + ReLU: feed the weight dtype (bf16 fast path) into the MXU,
    # accumulate in f32; bias add + ReLU stay in f32 on the VPU.
    x = x_ref[...].astype(w1_ref.dtype)   # no-op if caller already passes bf16
    h = jnp.dot(x, w1_ref[...], preferred_element_type=jnp.float32)
    h = jnp.maximum(h + b1_ref[...], 0.0)
    # fc2 + ReLU
    o = jnp.dot(h.astype(w2_ref.dtype), w2_ref[...],
                preferred_element_type=jnp.float32)
    o = jnp.maximum(o + b2_ref[...], 0.0)
    o_ref[...] = o.astype(o_ref.dtype)


def local_logistic(x, w1, b1, w2, b2, *, tm=2048,
                   compute_dtype=jnp.bfloat16, out_dtype=None):
    """relu(relu(x @ w1 + b1) @ w2 + b2) as a single fused Pallas kernel.

    x:  (B, D) f32 or bf16 (bf16 input halves x DMA bytes; push the downcast
        into the producing layer, not this wrapper)
    w1: (D, 256)   b1: (1, 256)
    w2: (256, 128) b2: (1, 128)
    tm: max batch tile (rows per grid step); actual tile is clamped so the
        grid keeps >=4 steps for moderate B (v7x megacore balance).
    compute_dtype: dtype fed to the MXU (bf16 fast path; pass jnp.float32 for
        exact-parity with the PyTorch f32 reference).
    out_dtype: output dtype; default x.dtype.  bf16 halves the dominant
        output writeback on this HBM-bound kernel if consumers accept it.
    """
    B, D = x.shape
    assert w1.shape == (D, HIDDEN1)
    assert b1.shape == (1, HIDDEN1)
    assert w2.shape == (HIDDEN1, HIDDEN2)
    assert b2.shape == (1, HIDDEN2)

    out_dtype = x.dtype if out_dtype is None else out_dtype
    tm_eff = _choose_tile(B, tm)
    grid = (pl.cdiv(B, tm_eff),)   # ragged last block: stores are masked

    # bf16 weights halve weight VMEM/vreg footprint and hit the fast MXU path;
    # biases stay f32 for the VPU epilogue (v5e has no bf16 VALU).
    w1c = w1.astype(compute_dtype)
    w2c = w2.astype(compute_dtype)
    b1c = b1.astype(jnp.float32)
    b2c = b2.astype(jnp.float32)

    # NOTE: if input_dim ever grows to many thousands, add a K grid axis with
    # a (tm, HIDDEN1) f32 accumulator and do fc2 in the k==last epilogue; at
    # the shapes this module uses (D ~ tens), a single K block is optimal.
    return pl.pallas_call(
        _local_logistic_kernel,
        out_shape=jax.ShapeDtypeStruct((B, HIDDEN2), out_dtype),
        grid=grid,
        in_specs=[
            # Batch-tiled input: streams through VMEM, double-buffered.
            pl.BlockSpec((tm_eff, D), lambda i: (i, 0)),
            # Weights / biases: constant index_map -> VMEM-resident, DMA'd once.
            pl.BlockSpec((D, HIDDEN1), lambda i: (0, 0)),
            pl.BlockSpec((1, HIDDEN1), lambda i: (0, 0)),
            pl.BlockSpec((HIDDEN1, HIDDEN2), lambda i: (0, 0)),
            pl.BlockSpec((1, HIDDEN2), lambda i: (0, 0)),
        ],
        # Lane-dense 128-wide output block (full HIDDEN2, never split N).
        out_specs=pl.BlockSpec((tm_eff, HIDDEN2), lambda i: (i, 0)),
        compiler_params=pltpu.CompilerParams(
            # Batch axis is embarrassingly parallel -> megacore sharding on v7x.
            # Peak VMEM is <6 MiB even at tm=2048, so the default scoped VMEM
            # limit is fine (no vmem_limit_bytes override needed).
            dimension_semantics=("parallel",),
        ),
    )(x, w1c, b1c, w2c, b2c)


def init_params(key, input_dim):
    """Deterministic synthetic init mimicking nn.Linear's uniform(-1/sqrt(fan_in), ...)."""
    k1, k2, k3, k4 = jax.random.split(key, 4)
    bound1 = 1.0 / jnp.sqrt(input_dim)
    bound2 = 1.0 / jnp.sqrt(HIDDEN1)
    w1 = jax.random.uniform(k1, (input_dim, HIDDEN1), jnp.float32, -bound1, bound1)
    b1 = jax.random.uniform(k2, (1, HIDDEN1), jnp.float32, -bound1, bound1)
    w2 = jax.random.uniform(k3, (HIDDEN1, HIDDEN2), jnp.float32, -bound2, bound2)
    b2 = jax.random.uniform(k4, (1, HIDDEN2), jnp.float32, -bound2, bound2)
    return w1, b1, w2, b2


if __name__ == "__main__":
    key = jax.random.PRNGKey(0)
    kx, kp = jax.random.split(key)

    # Small demo shapes; tm=8 with B=13 forces a multi-step grid with a ragged
    # last block (13 = 8 + 5), exercising the masked-store path end to end.
    batch, input_dim = 13, 32
    x = jax.random.normal(kx, (batch, input_dim), jnp.float32)
    w1, b1, w2, b2 = init_params(kp, input_dim)

    out = local_logistic(x, w1, b1, w2, b2, tm=8)
    out = jax.block_until_ready(out)

    # Pure-JAX f32 reference; tolerance relaxed for the bf16 MXU path.
    ref = jnp.maximum(x @ w1 + b1, 0.0)
    ref = jnp.maximum(ref @ w2 + b2, 0.0)
    assert out.shape == (batch, HIDDEN2)
    assert jnp.allclose(out, ref, atol=2e-2, rtol=2e-2), (
        f"max abs err {jnp.max(jnp.abs(out - ref))}")

    print("KERNEL_OK")
</pallas_src>

<mosaic_0001>
module attributes {stable_mosaic.version = 11 : i64} {
  func.func @_local_logistic_kernel(%arg0: i32, %arg1: memref<8x32xf32, #tpu.memory_space<vmem>>, %arg2: memref<32x256xbf16, #tpu.memory_space<vmem>>, %arg3: memref<1x256xf32, #tpu.memory_space<vmem>>, %arg4: memref<256x128xbf16, #tpu.memory_space<vmem>>, %arg5: memref<1x128xf32, #tpu.memory_space<vmem>>, %arg6: memref<8x128xf32, #tpu.memory_space<vmem>>) attributes {dimension_semantics = [#tpu.dimension_semantics<parallel>], iteration_bounds = array<i64: 2>, scalar_prefetch = 0 : i64, scratch_operands = 0 : i64, tpu.core_type = #tpu.core_type<tc>, window_params = [{transform_indices = @transform_0, window_bounds = array<i64: 8, 32>}, {pipeline_mode = #tpu.pipeline_mode<synchronous>, transform_indices = @transform_1, window_bounds = array<i64: 32, 256>}, {pipeline_mode = #tpu.pipeline_mode<synchronous>, transform_indices = @transform_2, window_bounds = array<i64: 1, 256>}, {pipeline_mode = #tpu.pipeline_mode<synchronous>, transform_indices = @transform_3, window_bounds = array<i64: 256, 128>}, {pipeline_mode = #tpu.pipeline_mode<synchronous>, transform_indices = @transform_4, window_bounds = array<i64: 1, 128>}, {transform_indices = @transform_5, window_bounds = array<i64: 8, 128>}]} {
    %c0 = arith.constant 0 : index
    %c0_0 = arith.constant 0 : index
    %0 = vector.load %arg1[%c0, %c0_0] : memref<8x32xf32, #tpu.memory_space<vmem>>, vector<8x32xf32>
    %1 = arith.truncf %0 : vector<8x32xf32> to vector<8x32xbf16>
    %c0_1 = arith.constant 0 : index
    %c0_2 = arith.constant 0 : index
    %2 = vector.load %arg2[%c0_1, %c0_2] : memref<32x256xbf16, #tpu.memory_space<vmem>>, vector<32x256xbf16>
    %cst = arith.constant dense<0.000000e+00> : vector<8x256xf32>
    %3 = tpu.matmul %1, %2, %cst {dimension_numbers = #tpu.dot_dimension_numbers<[1], [0], [0], [1], [0, 0, 1, 1], [], []>} : vector<8x32xbf16>, vector<32x256xbf16>, vector<8x256xf32> -> vector<8x256xf32>
    %c0_3 = arith.constant 0 : index
    %c0_4 = arith.constant 0 : index
    %4 = vector.load %arg3[%c0_3, %c0_4] : memref<1x256xf32, #tpu.memory_space<vmem>>, vector<1x256xf32>
    %5 = vector.broadcast %4 : vector<1x256xf32> to vector<8x256xf32>
    %6 = arith.addf %3, %5 : vector<8x256xf32>
    %cst_5 = arith.constant 0.000000e+00 : f32
    %7 = vector.broadcast %cst_5 : f32 to vector<8x256xf32>
    %8 = arith.maximumf %6, %7 : vector<8x256xf32>
    %9 = arith.truncf %8 : vector<8x256xf32> to vector<8x256xbf16>
    %c0_6 = arith.constant 0 : index
    %c0_7 = arith.constant 0 : index
    %10 = vector.load %arg4[%c0_6, %c0_7] : memref<256x128xbf16, #tpu.memory_space<vmem>>, vector<256x128xbf16>
    %cst_8 = arith.constant dense<0.000000e+00> : vector<8x128xf32>
    %11 = tpu.matmul %9, %10, %cst_8 {dimension_numbers = #tpu.dot_dimension_numbers<[1], [0], [0], [1], [0, 0, 1, 1], [], []>} : vector<8x256xbf16>, vector<256x128xbf16>, vector<8x128xf32> -> vector<8x128xf32>
    %c0_9 = arith.constant 0 : index
    %c0_10 = arith.constant 0 : index
    %12 = vector.load %arg5[%c0_9, %c0_10] : memref<1x128xf32, #tpu.memory_space<vmem>>, vector<1x128xf32>
    %13 = vector.broadcast %12 : vector<1x128xf32> to vector<8x128xf32>
    %14 = arith.addf %11, %13 : vector<8x128xf32>
    %cst_11 = arith.constant 0.000000e+00 : f32
    %15 = vector.broadcast %cst_11 : f32 to vector<8x128xf32>
    %16 = arith.maximumf %14, %15 : vector<8x128xf32>
    %c0_12 = arith.constant 0 : index
    %c0_13 = arith.constant 0 : index
    %17 = vector.load %arg6[%c0_12, %c0_13] : memref<8x128xf32, #tpu.memory_space<vmem>>, vector<8x128xf32>
    tpu.vector_store %arg6[%c0_12, %c0_13], %16 {strides = array<i32>} : memref<8x128xf32, #tpu.memory_space<vmem>>, vector<8x128xf32>,
    return
  }
  func.func @transform_0(%arg0: i32) -> (i32, i32) {
    %c0_i32 = arith.constant 0 : i32
    %c0_i32_0 = arith.constant 0 : i32
    return %arg0, %c0_i32 : i32, i32
  }
  func.func @transform_1(%arg0: i32) -> (i32, i32) {
    %c0_i32 = arith.constant 0 : i32
    %c0_i32_0 = arith.constant 0 : i32
    %c0_i32_1 = arith.constant 0 : i32
    return %c0_i32, %c0_i32_0 : i32, i32
  }
  func.func @transform_2(%arg0: i32) -> (i32, i32) {
    %c0_i32 = arith.constant 0 : i32
    %c0_i32_0 = arith.constant 0 : i32
    %c0_i32_1 = arith.constant 0 : i32
    return %c0_i32, %c0_i32_0 : i32, i32
  }
  func.func @transform_3(%arg0: i32) -> (i32, i32) {
    %c0_i32 = arith.constant 0 : i32
    %c0_i32_0 = arith.constant 0 : i32
    %c0_i32_1 = arith.constant 0 : i32
    return %c0_i32, %c0_i32_0 : i32, i32
  }
  func.func @transform_4(%arg0: i32) -> (i32, i32) {
    %c0_i32 = arith.constant 0 : i32
    %c0_i32_0 = arith.constant 0 : i32
    %c0_i32_1 = arith.constant 0 : i32
    return %c0_i32, %c0_i32_0 : i32, i32
  }
  func.func @transform_5(%arg0: i32) -> (i32, i32) {
    %c0_i32 = arith.constant 0 : i32
    %c0_i32_0 = arith.constant 0 : i32
    return %arg0, %c0_i32 : i32, i32
  }
}

</mosaic_0001>

<bundles_post_ra>
// kernel: tpu_custom_call.1
= control target key start
LH: loop header
LB: loop body
LE: loop exit
PB: predicated region body
PF: predicated region fallthrough
CT: control target
= control target key end

     0   :  { %10 = vsyncpa [#allocation3], 0  ;;  %s1227_s0 = inlined_call_operand.hbm [shape: f32[13,32], index: 0, kind: input, shape index: {}]   ;;  %s1228_s1 = inlined_call_operand.hbm [shape: bf16[32,256], index: 1, kind: input, shape index: {}]   ;;  %s1229_s2 = inlined_call_operand.vmem [shape: f32[1,256], index: 2, kind: input, shape index: {}]   ;;  %s1230_s3 = inlined_call_operand.hbm [shape: bf16[256,128], index: 3, kind: input, shape index: {}]   ;;  %s1231_s4 = inlined_call_operand.vmem [shape: f32[1,128], index: 4, kind: input, shape index: {}]   ;;  %s1232_s5 = inlined_call_operand.hbm [shape: f32[13,128], index: 5, kind: output, shape index: {}]  }
   0x1   :  { %12 = vsyncpa [#allocation3 + $0x1], 0 }
   0x2   :  { %13 = vsyncpa [#allocation6], 0 }
   0x3   :  { %14 = vsyncpa [#allocation4], 0 }
   0x4   :  { %16 = vsyncpa [#allocation4 + $0x1], 0  ;;  %s988_s18 = smov 0   ;;  %s990_s19 = smov 0  }
   0x5   :  { %s992_s20 = smov 0   ;;  %s994_s21 = smov 0  }
   0x6 LB: > { %s1009_s22 = sadd.s32 4294967295, %s947_s21   ;;  %s637_s23 = sadd.s32 4294967294, %s947_s21   ;;  %s947_s21 = sphi %s994_s21, %s1252_s21   ;;  %s943_s20 = sphi %s992_s20, %s1251_s20   ;;  %s939_s19 = sphi %s990_s19, %s1250_s19   ;;  %s935_s18 = sphi %s988_s18, %s1249_s18  }
   0x7   : > { %p42_p0 = scmp.ne.s32.totalorder %s939_s19, %s935_s18  ;;  %p1233_p1 = scmp.eq.s32.totalorder %s1009_s22, 0 }
   0x8   : > { %p156_p3 = scmp.eq.s32.totalorder %s637_s23, 1  ;;  %p638_p5 = scmp.ge.s32.totalorder %s947_s21, 1 }
   0x9   : > { %p1018_p4 = por %p1233_p1, %p42_p0  ;;  %p163_p7 = scmp.lt.s32.totalorder %s947_s21, 3 }
   0xa   : > { %p1023_p6 = por %p156_p3, %p42_p0  ;;  %s949_s27 = smov [#allocation5]  }
   0xb   : > { %s1236_s24 = scalar_select %p1018_p4, 1, 0 }
   0xc   : > { %s1237_s25 = scalar_select %p1023_p6, 1, 0 }
   0xd   : > { %p1028_p8 = pnand %p638_p5, %p163_p7  ;;  %s175_s28 = sshll.u32 %s949_s27, 4  ;;  %s1032_s28 = int_to_ptr.vmem [resolvable:$true] %s175_s28 }
   0xe   : > { %s950_s30 = smov [#allocation7]   ;;  %s791_s9 = scalar_lea.hbm %s1228_s1, 512 }
   0xf   : > { %p709_p9 = pneg %p1028_p8  ;;  %s191_s6 = sshll.u32 %s950_s30, 4  ;;  %s1043_s6 = int_to_ptr.vmem [resolvable:$true] %s191_s6 }
  0x10   : > { %p792_p12 = scmp.ne.s32.totalorder %s1228_s1, %s791_s9  ;;  %p798_p5 = scmp.lt.u32.totalorder %s791_s9, %s1228_s1 }
  0x11   : > { %p1039_p11 = pnand %p709_p9, %p1233_p1 }
  0x13   : > { %p793_p13 = pneg %p1039_p11 }
  0x15   : > { %p794_p0 = pnand %p793_p13, %p792_p12 }
  0x17   : > { %p795_p3 = pneg %p794_p0 }
  0x19   : > { %p800_p7 = pnand %p798_p5, %p795_p3 }
  0x1b   : > { %803 = shalt.err (!%p800_p7)
}
  0x1c   : > { %s804_s14 = scalar_lea.vmem %s1032_s28, 512  ;;  %p812_p2 = scmp.lt.s32.totalorder %s1032_s28, %s1032_s28 }
  0x1d   : > { %p805_p9 = scmp.ne.s32.totalorder %s1032_s28, %s804_s14  ;;  %p813_p12 = scmp.lt.s32.totalorder %s804_s14, %s804_s14 }
  0x1f   : > { %p807_p10 = pnand %p805_p9, %p793_p13  ;;  %p814_p0 = por %p813_p12, %p812_p2 }
  0x21   : > { %p808_p1 = pneg %p807_p10 }
  0x23   : > { %p815_p6 = pnand %p814_p0, %p808_p1 }
  0x25   : > { %818 = shalt.err (!%p815_p6)
}
  0x26   : > { %s951_s15 = smov 128   ;;  %s952_s16 = smov 8  }
  0x27   : > { %712 = dma.hbm_to_vmem [thread:$0]  (!%p1039_p11), %s1228_s1, 512, %s1032_s28, [#allocation6], %s951_s15, %s951_s15, %s952_s16  }
  0x28   : > { %s819_s7 = scalar_lea.hbm %s1230_s3, 2048 }
  0x29   : > { %p820_p2 = scmp.ne.s32.totalorder %s1230_s3, %s819_s7  ;;  %p826_p10 = scmp.lt.u32.totalorder %s819_s7, %s1230_s3 }
  0x2b   : > { %p822_p1 = pnand %p820_p2, %p793_p13 }
  0x2d   : > { %p823_p6 = pneg %p822_p1 }
  0x2f   : > { %p828_p3 = pnand %p826_p10, %p823_p6 }
  0x31   : > { %831 = shalt.err (!%p828_p3)
}
  0x32   : > { %s832_s28 = scalar_lea.vmem %s1043_s6, 2048  ;;  %p840_p12 = scmp.lt.s32.totalorder %s1043_s6, %s1043_s6 }
  0x33   : > { %p833_p5 = scmp.ne.s32.totalorder %s1043_s6, %s832_s28  ;;  %p841_p0 = scmp.lt.s32.totalorder %s832_s28, %s832_s28 }
  0x35   : > { %p835_p7 = pnand %p833_p5, %p793_p13  ;;  %p842_p2 = por %p841_p0, %p840_p12 }
  0x37   : > { %p836_p9 = pneg %p835_p7 }
  0x39   : > { %p843_p1 = pnand %p842_p2, %p836_p9 }
  0x3b   : > { %846 = shalt.err (!%p843_p1)
}
  0x3c   : > { %s953_s12 = smov 64   ;;  %s954_s13 = smov 4  }
  0x3d   : > { %715 = dma.hbm_to_vmem [thread:$0]  (!%p1039_p11), %s1230_s3, 2048, %s1043_s6, [#allocation6], %s953_s12, %s953_s12, %s954_s13  }
  0x3e   : > { %s1098_s16 = sadd.s32 1, %s947_s21   ;;  %s29_s23 = sadd.s32 1, %s943_s20 }
  0x3f   : > { %s26_s17 = ssub.s32 %s947_s21, %s1098_s16  ;;  %p36_p6 = scmp.ne.s32.totalorder %s943_s20, %s939_s19 }
  0x40   : > { %p27_p13 = scmp.eq.s32.totalorder %s26_s17, 0  ;;  %p37_p10 = scmp.eq.s32.totalorder %s947_s21, 0 }
  0x41   : > { %p1240_p5 = scmp.eq.s32.totalorder %s1009_s22, 1  ;;  %p726_p9 = scmp.lt.s32.totalorder %s947_s21, 2 }
  0x42   : > { %s1107_s27 = scalar_select %p27_p13, %s943_s20, %s29_s23  }
  0x43   : > { %p38_p3 = por %p37_p10, %p36_p6  ;;  %p1111_p7 = por %p1240_p5, %p36_p6 }
  0x44   : > { %s208_s29 = sand.u32 1, %s943_s20   ;;  %s643_s6 = sshll.u32 %s947_s21, 7 }
  0x45   : > { %s1241_s30 = scalar_select %p1111_p7, 1, 0 }
  0x46   : > { %s642_s7 = sshll.u32 %s208_s29, 3  ;;  %s1121_s10 = scalar_lea.hbm %s1227_s0, %s643_s6 }
  0x47   : > { %s212_s11 = scalar_lea.vmem [#allocation2], %s642_s7  ;;  %p1125_p11 = pnand %p726_p9, %p38_p3 }
  0x48   : > { %s219_s28 = sshll.u32 %s212_s11, 4  ;;  %s209_s13 = scalar_lea.sflag [#allocation3], %s208_s29  ;;  %s1123_s28 = int_to_ptr.vmem [resolvable:$true] %s219_s28 }
  0x49   : > { %s847_s14 = scalar_lea.hbm %s1121_s10, 128  ;;  %p849_p0 = pneg %p1125_p11 }
  0x4a   : > { %p848_p12 = scmp.ne.s32.totalorder %s1121_s10, %s847_s14  ;;  %s852_s23 = scalar_lea.hbm %s1227_s0, 256 }
  0x4b   : > { %p853_p13 = scmp.lt.u32.totalorder %s1121_s10, %s1227_s0  ;;  %p854_p6 = scmp.lt.u32.totalorder %s852_s23, %s847_s14 }
  0x4c   : > { %p850_p2 = pnand %p849_p0, %p848_p12  ;;  %p856_p3 = scmp.lt.u32.totalorder %s847_s14, %s1121_s10 }
  0x4d   : > { %p855_p10 = por %p854_p6, %p853_p13 }
  0x4e   : > { %p851_p1 = pneg %p850_p2 }
  0x4f   : > { %p857_p5 = por %p856_p3, %p855_p10 }
  0x51   : > { %p858_p9 = pnand %p857_p5, %p851_p1 }
  0x53   : > { %861 = shalt.err (!%p858_p9)
}
  0x54   : > { %s862_s29 = scalar_lea.vmem %s1123_s28, 128  ;;  %s955_s8 = smov [#allocation2]  }
  0x55   : > { %p863_p12 = scmp.ne.s32.totalorder %s1123_s28, %s862_s29  ;;  %s867_s9 = sshll.u32 %s955_s8, 4  ;;  %s868_s9 = int_to_ptr.vmem [resolvable:$false] %s867_s9 }
  0x56   : > { %s869_s11 = scalar_lea.vmem %s868_s9, 256  ;;  %p870_p4 = scmp.lt.s32.totalorder %s1123_s28, %s868_s9 }
  0x57   : > { %p865_p2 = pnand %p863_p12, %p849_p0  ;;  %p871_p13 = scmp.lt.s32.totalorder %s869_s11, %s862_s29 }
  0x59   : > { %p866_p7 = pneg %p865_p2  ;;  %p872_p6 = por %p871_p13, %p870_p4 }
  0x5b   : > { %p873_p10 = pnand %p872_p6, %p866_p7 }
  0x5d   : > { %876 = shalt.err (!%p873_p10)
}
  0x5e   : > { %719 = dma.hbm_to_vmem [thread:$0]  (!%p1125_p11), %s1121_s10, 128, %s1123_s28, %s209_s13  }
  0x5f   : > { %228 = sbr.rel (%p1028_p8) target bundleno = 568 (0x238), region = 40  ;;  %s1157_s14 = sand.u32 (!%p1028_p8), 1, %s939_s19  }
  0x60   : > { %s645_s15 = sshll.u32 (!%p1028_p8), %s1157_s14, 3  ;;  %s231_s17 = scalar_lea.sflag (!%p1028_p8), [#allocation3], %s1157_s14 }
  0x61   : > { %s234_s23 = scalar_lea.vmem (!%p1028_p8), [#allocation2], %s645_s15  ;;  %p1243_p4 = scmp.ne.s32.totalorder (!%p1028_p8), %s1236_s24, 0 }
  0x66   : > { %922 = dma.done.wait (%p1243_p4), %s231_s17, 128  }
  0x67   : > { %924 = vsyncadd (%p1243_p4), %s231_s17, 4294967168  ;;  %p1244_p7 = scmp.eq.s32.totalorder %s1009_s22, 0 }
  0x69   : > { %926 = dma.done.wait (%p1244_p7), [#allocation6], 2560   ;;  %p1245_p8 = pmov %p1244_p7 }
  0x6a   : > { %v956_v0 = vmov 0   ;;  %v769_v1 = vld [vmem:[#allocation5 + $0x4] ss:$8 sps:$4 sm:$0xff]   ;;  %v771_v2 = vld [vmem:[#allocation5] ss:$8 sps:$4 sm:$0xff]   ;;  %v270_v5 = vld [vmem:[%s234_s23] sm:$0xff]  ;;  %v278_v23 = vlaneseq }
  0x6b   : > { %928 = vsyncadd (%p1245_p8), [#allocation6], 4294964736  ;;  %344 = vmatprep.mubr.bf16.mxu0 %v956_v0  ;;  %312 = vmatprep.subr.bf16.mxu0 %v769_v1  ;;  %v772_v3 = vld [vmem:[#allocation5 + $0x14] ss:$8 sps:$4 sm:$0xff]   ;;  %v774_v4 = vld [vmem:[#allocation5 + $0x10] ss:$8 sps:$4 sm:$0xff]   ;;  %v271_v9 = vpack.c.bf16 %v270_v5, %v270_v5 }
  0x6c   : > { %313 = vmatpush1.bf16.msra.mxu0 %v771_v2  ;;  %v775_v6 = vld [vmem:[#allocation7 + $0x40] sm:$0xff]   ;;  %v777_v8 = vld [vmem:[#allocation7 + $0x48] sm:$0xff]   ;;  %vm308_vm0 = vcmask 261120   ;;  %v779_v11 = vld [vmem:[#allocation7 + $0x50] sm:$0xff]   ;;  %v279_v24 = vshrl.u32 %v278_v23, 7  ;;  %s672_s12 = sshll.u32 %s1009_s22, 7 }
  0x6d   : > { %314 = vmatprep.subr.bf16.mxu0 %v772_v3  ;;  %v776_v7 = vld [vmem:[#allocation7] sm:$0xff]   ;;  %675 = vmatprep.subr.bf16.mxu1 %v775_v6  ;;  %v778_v10 = vld [vmem:[#allocation7 + $0x8] sm:$0xff]   ;;  %v780_v12 = vld [vmem:[#allocation7 + $0x10] sm:$0xff]   ;;  %s268_s13 = scalar_lea.vmem [#allocation8], %s645_s15  ;;  %s1183_s8 = scalar_lea.hbm %s1232_s5, %s672_s12 }
  0x6e   : > { %676 = vmatpush3.bf16.msra.mxu1 %v776_v7  ;;  %v781_v13 = vld [vmem:[#allocation7 + $0x58] sm:$0xff]   ;;  %v783_v15 = vld [vmem:[#allocation7 + $0x60] sm:$0xff]   ;;  %v785_v17 = vld [vmem:[#allocation7 + $0x68] sm:$0xff]   ;;  %v280_v25 = vsub.s32 0, %v279_v24  ;;  %v284_v27 = vsub.s32 1, %v279_v24  ;;  %s548_s7 = sshll.u32 %s268_s13, 4  ;;  %s1185_s7 = int_to_ptr.vmem [resolvable:$true] %s548_s7 }
  0x6f   : > { %677 = vmatprep.subr.bf16.mxu1 %v777_v8  ;;  %v782_v14 = vld [vmem:[#allocation7 + $0x18] sm:$0xff]   ;;  %v784_v16 = vld [vmem:[#allocation7 + $0x20] sm:$0xff]   ;;  %v786_v18 = vld [vmem:[#allocation7 + $0x28] sm:$0xff]   ;;  %s535_s9 = scalar_lea.sflag [#allocation4], %s1157_s14  ;;  %s877_s11 = scalar_lea.vmem %s1185_s7, 128 }
  0x70   : > { %315 = vmatpush1.bf16.msra.mxu0 %v774_v4  ;;  %v787_v19 = vld [vmem:[#allocation7 + $0x70] sm:$0xff]   ;;  %v789_v21 = vld [vmem:[#allocation7 + $0x78] sm:$0xff]   ;;  %p878_p11 = scmp.ne.s32.totalorder %s1185_s7, %s877_s11  ;;  %p1246_p0 = scmp.ne.s32.totalorder %s1241_s30, 0 }
  0x71   : > { %v788_v20 = vld [vmem:[#allocation7 + $0x30] sm:$0xff]   ;;  %v790_v22 = vld [vmem:[#allocation7 + $0x38] sm:$0xff]   ;;  %s957_s22 = smov [#allocation8]  }
  0x72   : > { %678 = vmatpush3.bf16.msra.mxu1 %v778_v10  ;;  %v276_v26 = vld [vmem:[%s1229_s2] sm:$0x3]  ;;  %p879_p1 = pnand %p878_p11, %p1246_p0  ;;  %s881_s15 = sshll.u32 %s957_s22, 4  ;;  %s882_s15 = int_to_ptr.vmem [resolvable:$false] %s881_s15 }
  0x73   : > { %653 = vmatmul.mubr.msk.bf16.vlgmr.msra.gmra.mrb[0].mxu0 %vm308_vm0, %v271_v9  ;;  %679 = vmatprep.subr.bf16.mxu1 %v779_v11  ;;  %v281_v28 = vrot.slane %v276_v26, %v280_v25  ;;  %v285_v29 = vrot.slane %v276_v26, %v284_v27  ;;  %v654_v41 = vld [vmem:[%s1231_s4] ss:$0 sm:$0xff]  ;;  %s883_s17 = scalar_lea.vmem %s882_s15, 256  ;;  %p884_p5 = scmp.lt.s32.totalorder %s1185_s7, %s882_s15 }
  0x74   : > { %p880_p3 = pneg %p879_p1  ;;  %p885_p9 = scmp.lt.s32.totalorder %s883_s17, %s877_s11 }
  0x76   : > { %680 = vmatpush3.bf16.msra.mxu1 %v780_v12  ;;  %p886_p12 = por %p885_p9, %p884_p5 }
  0x77   : > { %681 = vmatprep.subr.bf16.mxu1 %v781_v13 }
  0x78   : > { %p887_p2 = pnand %p886_p12, %p880_p3 }
  0x7a   : > { %682 = vmatpush3.bf16.msra.mxu1 %v782_v14 }
  0x7b   : > { %683 = vmatprep.subr.bf16.mxu1 %v783_v15 }
  0x7e   : > { %684 = vmatpush3.bf16.msra.mxu1 %v784_v16 }
  0x7f   : > { %685 = vmatprep.subr.bf16.mxu1 %v785_v17 }
  0x82   : > { %686 = vmatpush3.bf16.msra.mxu1 %v786_v18 }
  0x83   : > { %687 = vmatprep.subr.bf16.mxu1 %v787_v19 }
  0x86   : > { %688 = vmatpush3.bf16.msra.mxu1 %v788_v20 }
  0x87   : > { %689 = vmatprep.subr.bf16.mxu1 %v789_v21 }
  0x8a   : > { %690 = vmatpush3.bf16.msra.mxu1 %v790_v22 }
 0x146   : > { %v346_v30 = vpop.f32.mrb[0].mxu0 }
 0x147   : > { %v347_v31 = vadd.f32 %v346_v30, %v281_v28  ;;  %v348_v32 = vpop.f32.mrb[1].mxu0 }
 0x148   : > { %v349_v33 = vadd.f32 %v348_v32, %v285_v29  ;;  %v350_v34 = vpop.f32.mrb[2].mxu0 }
 0x149   : > { %v353_v35 = vmax.f32 %v347_v31, 0.0  ;;  %v351_v36 = vpop.f32.mrb[3].mxu0 }
 0x14a   : > { %v354_v37 = vmax.f32 %v349_v33, 0.0 }
 0x14b   : > { %v355_v39 = vpack.c.bf16 %v353_v35, %v353_v35 }
 0x14c   : > { %v356_v38 = vpack.c.bf16 %v354_v37, %v354_v37 }
 0x14e   : > { %524 = vmatprep.mubr.bf16.mxu1 %v356_v38 }
 0x14f   : > { %525 = vmatmul.mubr.bf16.vlgmr.msra.gmra.mrb[0].mxu1 %v355_v39 }
 0x222   : > { %v691_v40 = vpop.f32.mrb[0].mxu1 }
 0x223   : > { %v692_v42 = vpop.f32.mrb[1].mxu1 }
 0x224   : > { %v693_v43 = vadd.f32 %v692_v42, %v691_v40  ;;  %v694_v44 = vpop.f32.mrb[2].mxu1 }
 0x225   : > { %v695_v45 = vpop.f32.mrb[3].mxu1 }
 0x226   : > { %v527_v46 = vadd.f32 %v693_v43, %v654_v41 }
 0x228   : > { %v532_v47 = vmax.f32 %v527_v46, 0.0 }
 0x22a   : > { %533 = vst [vmem:[%s268_s13] sm:$0xff] %v532_v47 }
 0x22b   : > { %890 = shalt.err (!%p887_p2)
}
 0x22c   : > { %s891_s14 = scalar_lea.hbm %s1183_s8, 128  ;;  %s895_s26 = scalar_lea.hbm %s1232_s5, 256 }
 0x22d   : > { %p892_p13 = scmp.ne.s32.totalorder %s1183_s8, %s891_s14  ;;  %p896_p4 = scmp.lt.u32.totalorder %s1183_s8, %s1232_s5 }
 0x22e   : > { %p897_p7 = scmp.lt.u32.totalorder %s895_s26, %s891_s14  ;;  %p899_p11 = scmp.lt.u32.totalorder %s891_s14, %s1183_s8 }
 0x22f   : > { %p893_p6 = pnand %p892_p13, %p1246_p0 }
 0x230   : > { %p898_p8 = por %p897_p7, %p896_p4 }
 0x231   : > { %p894_p10 = pneg %p893_p6 }
 0x232   : > { %p900_p1 = por %p899_p11, %p898_p8 }
 0x234   : > { %p901_p3 = pnand %p900_p1, %p894_p10 }
 0x236   : > { %904 = shalt.err (!%p901_p3)
}
 0x237   : > { %707 = dma.vmem_to_hbm [thread:$0]  (%p1246_p0), %s1185_s7, 128, %s1183_s8, %s535_s9  }
 0x238 PF: > { %s560_s12 = sand.u32 1, %s935_s18   ;;  %p1247_p5 = scmp.ne.s32.totalorder %s1237_s25, 0 }
 0x239   : > { %p1248_p9 = scmp.ge.s32.totalorder %s947_s21, 2  ;;  %s561_s13 = scalar_lea.sflag [#allocation4], %s560_s12 }
 0x23b   : > { %p721_p12 = pnand %p1248_p9, %p1247_p5 }
 0x23d   : > { %930 = dma.done.wait (!%p721_p12), %s561_s13, 128  }
 0x23e   : > { %932 = vsyncadd (!%p721_p12), %s561_s13, 4294967168  ;;  %p19_p2 = scmp.ge.s32.totalorder %s1098_s16, 4   ;;  %s1249_s18 = smov %s939_s19 }
 0x23f   : > { %s1250_s19 = smov %s943_s20  ;;  %s1251_s20 = smov %s1107_s27 }
 0x240   : > { %s1252_s21 = smov %s1098_s16  ;;  %21 = sbr.rel (!%p19_p2) target bundleno = 6 (0x6), region = 93 }
 0x247   :  { %566 = vsyncpa [#allocation3], 1 }
 0x248   :  { %568 = vsyncpa [#allocation3 + $0x1], 1 }
 0x249   :  { %569 = vsyncpa [#allocation6], 1 }
 0x24a   :  { %570 = vsyncpa [#allocation4], 1 }
 0x24b   :  { %572 = vsyncpa [#allocation4 + $0x1], 1 }

</bundles_post_ra>
